<compile_context>
chip_gen: v5e
topology: v5e:2x2
jax: 0.10.0
libtpu: 0.0.40
codegen_flags: <defaults>
</compile_context>

<pallas_src>
import jax
import jax.numpy as jnp
from jax.experimental import pallas as pl
from jax.experimental.pallas import tpu as pltpu


def conv_relu_kernel(cols_ref, w_ref, o_ref):
    # cols_ref: (N, K, HW)   im2col patches, K = Cin*KH*KW, HW on lanes
    # w_ref:    (Cout, K)    flattened conv weights (stationary operand)
    # o_ref:    (N, Cout, HW) lane-dense output (already NCHW order)
    w = w_ref[...]
    for n in range(o_ref.shape[0]):          # tiny static batch, fully unrolled
        acc = jnp.dot(w, cols_ref[n], preferred_element_type=jnp.float32)
        o_ref[n] = jnp.maximum(acc, 0.0).astype(o_ref.dtype)   # fused ReLU


def conv_relu(x_nchw, w_oihw, *, stride=1, padding=1, compute_dtype=jnp.bfloat16):
    """Conv2d(bias=False) + ReLU, matching nn.Conv2d(..., stride, padding).

    compute_dtype: dtype of the MXU operands (accumulation is always f32).
    None keeps the input dtype.  groups=1, dilation=1 only.
    """
    N, Cin, H, W = x_nchw.shape
    Cout, Cin_w, KH, KW = w_oihw.shape
    assert Cin == Cin_w

    Hout = (H + 2 * padding - KH) // stride + 1
    Wout = (W + 2 * padding - KW) // stride + 1
    HW = Hout * Wout
    K = Cin * KH * KW
    out_dtype = x_nchw.dtype

    x = x_nchw
    w_mat = w_oihw.reshape(Cout, K)           # OIHW flatten == (cin, kh, kw) order
    if compute_dtype is not None:
        x = x.astype(compute_dtype)           # cast before im2col: 9x-expanded
        w_mat = w_mat.astype(compute_dtype)   # cols are built & DMA'd in bf16

    # ---- XLA-side glue: K-major im2col directly from NCHW ------------------
    x_pad = jnp.pad(x, ((0, 0), (0, 0), (padding, padding), (padding, padding)))
    taps = []
    for kh in range(KH):
        for kw in range(KW):
            taps.append(x_pad[:, :, kh:kh + stride * Hout:stride,
                              kw:kw + stride * Wout:stride])
    # (N, Cin, KH*KW, Hout, Wout) -> (N, K, HW); K order (cin, kh, kw) matches w_mat.
    cols = jnp.stack(taps, axis=2).reshape(N, K, HW)

    itemsize = jnp.dtype(cols.dtype).itemsize
    cost = pl.CostEstimate(
        flops=2 * N * Cout * K * HW,
        transcendentals=0,
        bytes_accessed=itemsize * (N * K * HW + Cout * K)
        + jnp.dtype(out_dtype).itemsize * N * Cout * HW,
    )

    # ---- Pallas kernel: one invocation, whole batch -------------------------
    out = pl.pallas_call(
        conv_relu_kernel,
        out_shape=jax.ShapeDtypeStruct((N, Cout, HW), out_dtype),
        grid_spec=pltpu.PrefetchScalarGridSpec(
            num_scalar_prefetch=0,
            grid=(1,),
            in_specs=[
                pl.BlockSpec((N, K, HW), lambda i: (0, 0, 0)),
                pl.BlockSpec((Cout, K), lambda i: (0, 0)),
            ],
            out_specs=pl.BlockSpec((N, Cout, HW), lambda i: (0, 0, 0)),
        ),
        compiler_params=pltpu.CompilerParams(
            dimension_semantics=("arbitrary",)),
        cost_estimate=cost,
    )(cols, w_mat)

    # (N, Cout, Hout*Wout) is already NCHW order -> metadata-only reshape.
    return out.reshape(N, Cout, Hout, Wout)


if __name__ == "__main__":
    key = jax.random.PRNGKey(0)
    k_x, k_w = jax.random.split(key)

    # Small shapes consistent with the module: batch=2, in_ch=4, out_ch=8, 16x16.
    N, Cin, Cout, H, W = 2, 4, 8, 16, 16
    x = jax.random.normal(k_x, (N, Cin, H, W), dtype=jnp.float32)
    w = jax.random.normal(k_w, (Cout, Cin, 3, 3), dtype=jnp.float32) * 0.1

    # Exact-f32 path (matches the PyTorch module numerics).
    out_f32 = jax.block_until_ready(conv_relu(x, w, compute_dtype=jnp.float32))
    # Default path: bf16 MXU operands, f32 accumulation.
    out_bf16 = jax.block_until_ready(conv_relu(x, w))

    # Reference (pure JAX conv + relu), silent unless it fails.
    ref = jax.lax.conv_general_dilated(
        x, w, window_strides=(1, 1), padding=((1, 1), (1, 1)),
        dimension_numbers=("NCHW", "OIHW", "NCHW"))
    ref = jnp.maximum(ref, 0.0)

    assert out_f32.shape == (N, Cout, H, W)
    assert out_bf16.shape == (N, Cout, H, W)
    assert jnp.allclose(out_f32, ref, atol=1e-4, rtol=1e-4)
    assert jnp.allclose(out_bf16, ref, atol=6e-2, rtol=6e-2)

    print("KERNEL_OK")
</pallas_src>

<mosaic_0001>
module attributes {stable_mosaic.version = 11 : i64} {
  func.func @conv_relu_kernel(%arg0: i32, %arg1: memref<2x36x256xf32, #tpu.memory_space<vmem>>, %arg2: memref<8x36xf32, #tpu.memory_space<vmem>>, %arg3: memref<2x8x256xf32, #tpu.memory_space<vmem>>) attributes {dimension_semantics = [#tpu.dimension_semantics<arbitrary>], iteration_bounds = array<i64: 1>, scalar_prefetch = 0 : i64, scratch_operands = 0 : i64, tpu.core_type = #tpu.core_type<tc>, window_params = [{pipeline_mode = #tpu.pipeline_mode<synchronous>, transform_indices = @transform_0, window_bounds = array<i64: 2, 36, 256>}, {pipeline_mode = #tpu.pipeline_mode<synchronous>, transform_indices = @transform_1, window_bounds = array<i64: 8, 36>}, {pipeline_mode = #tpu.pipeline_mode<synchronous>, transform_indices = @transform_2, window_bounds = array<i64: 2, 8, 256>}]} {
    %c0 = arith.constant 0 : index
    %c0_0 = arith.constant 0 : index
    %0 = vector.load %arg2[%c0, %c0_0] : memref<8x36xf32, #tpu.memory_space<vmem>>, vector<8x36xf32>
    %c0_1 = arith.constant 0 : index
    %c0_2 = arith.constant 0 : index
    %c0_3 = arith.constant 0 : index
    %1 = vector.load %arg1[%c0_1, %c0_2, %c0_3] : memref<2x36x256xf32, #tpu.memory_space<vmem>>, vector<1x36x256xf32>
    %2 = vector.shape_cast %1 : vector<1x36x256xf32> to vector<36x256xf32>
    %cst = arith.constant dense<0.000000e+00> : vector<8x256xf32>
    %3 = tpu.matmul %0, %2, %cst {dimension_numbers = #tpu.dot_dimension_numbers<[1], [0], [0], [1], [0, 0, 1, 1], [], []>} : vector<8x36xf32>, vector<36x256xf32>, vector<8x256xf32> -> vector<8x256xf32>
    %cst_4 = arith.constant 0.000000e+00 : f32
    %4 = vector.broadcast %cst_4 : f32 to vector<8x256xf32>
    %5 = arith.maximumf %3, %4 : vector<8x256xf32>
    %c0_5 = arith.constant 0 : index
    %c0_6 = arith.constant 0 : index
    %c0_7 = arith.constant 0 : index
    %6 = vector.load %arg3[%c0_5, %c0_6, %c0_7] : memref<2x8x256xf32, #tpu.memory_space<vmem>>, vector<1x8x256xf32>
    %7 = vector.shape_cast %6 : vector<1x8x256xf32> to vector<8x256xf32>
    %8 = vector.shape_cast %5 : vector<8x256xf32> to vector<1x8x256xf32>
    tpu.vector_store %arg3[%c0_5, %c0_6, %c0_7], %8 {strides = array<i32>} : memref<2x8x256xf32, #tpu.memory_space<vmem>>, vector<1x8x256xf32>,
    %c1 = arith.constant 1 : index
    %c0_8 = arith.constant 0 : index
    %c0_9 = arith.constant 0 : index
    %9 = vector.load %arg1[%c1, %c0_8, %c0_9] : memref<2x36x256xf32, #tpu.memory_space<vmem>>, vector<1x36x256xf32>
    %10 = vector.shape_cast %9 : vector<1x36x256xf32> to vector<36x256xf32>
    %cst_10 = arith.constant dense<0.000000e+00> : vector<8x256xf32>
    %11 = tpu.matmul %0, %10, %cst_10 {dimension_numbers = #tpu.dot_dimension_numbers<[1], [0], [0], [1], [0, 0, 1, 1], [], []>} : vector<8x36xf32>, vector<36x256xf32>, vector<8x256xf32> -> vector<8x256xf32>
    %cst_11 = arith.constant 0.000000e+00 : f32
    %12 = vector.broadcast %cst_11 : f32 to vector<8x256xf32>
    %13 = arith.maximumf %11, %12 : vector<8x256xf32>
    %c1_12 = arith.constant 1 : index
    %c0_13 = arith.constant 0 : index
    %c0_14 = arith.constant 0 : index
    %14 = vector.load %arg3[%c1_12, %c0_13, %c0_14] : memref<2x8x256xf32, #tpu.memory_space<vmem>>, vector<1x8x256xf32>
    %15 = vector.shape_cast %14 : vector<1x8x256xf32> to vector<8x256xf32>
    %16 = vector.shape_cast %13 : vector<8x256xf32> to vector<1x8x256xf32>
    tpu.vector_store %arg3[%c1_12, %c0_13, %c0_14], %16 {strides = array<i32>} : memref<2x8x256xf32, #tpu.memory_space<vmem>>, vector<1x8x256xf32>,
    return
  }
  func.func @transform_0(%arg0: i32) -> (i32, i32, i32) {
    %c0_i32 = arith.constant 0 : i32
    %c0_i32_0 = arith.constant 0 : i32
    %c0_i32_1 = arith.constant 0 : i32
    %c0_i32_2 = arith.constant 0 : i32
    return %c0_i32, %c0_i32_0, %c0_i32_1 : i32, i32, i32
  }
  func.func @transform_1(%arg0: i32) -> (i32, i32) {
    %c0_i32 = arith.constant 0 : i32
    %c0_i32_0 = arith.constant 0 : i32
    %c0_i32_1 = arith.constant 0 : i32
    return %c0_i32, %c0_i32_0 : i32, i32
  }
  func.func @transform_2(%arg0: i32) -> (i32, i32, i32) {
    %c0_i32 = arith.constant 0 : i32
    %c0_i32_0 = arith.constant 0 : i32
    %c0_i32_1 = arith.constant 0 : i32
    %c0_i32_2 = arith.constant 0 : i32
    return %c0_i32, %c0_i32_0, %c0_i32_1 : i32, i32, i32
  }
}

</mosaic_0001>

<bundles_post_ra>
// kernel: tpu_custom_call.1
= control target key start
LH: loop header
LB: loop body
LE: loop exit
PB: predicated region body
PF: predicated region fallthrough
CT: control target
= control target key end

     0   :  { %vm27_vm0 = vcmask 1043456   ;;  %vm23_vm1 = vcmask 293888   ;;  %s297_s0 = inlined_call_operand.vmem [shape: f32[2,36,256], index: 0, kind: input, shape index: {}]   ;;  %s298_s1 = inlined_call_operand.vmem [shape: f32[8,36], index: 1, kind: input, shape index: {}]   ;;  %s299_s2 = inlined_call_operand.hbm [shape: f32[2,8,256], index: 2, kind: output, shape index: {}]  }
   0x1   :  { %v170_v0 = vld [vmem:[%s297_s0 + $0x90] sm:$0xf]  ;;  %v171_v1 = vld [vmem:[%s297_s0 + $0x98] sm:$0xf]  ;;  %v168_v2 = vld [vmem:[%s297_s0 + $0x80] sm:$0xff] }
   0x2   :  { %172 = vmatpush.msk.msra.mxu2 %vm27_vm0, %v170_v0  ;;  %174 = vmatpush.msk.msra.mxu3 %vm27_vm0, %v171_v1  ;;  %v169_v3 = vld [vmem:[%s297_s0 + $0x88] sm:$0xff]  ;;  %v166_v4 = vld [vmem:[%s297_s0 + $0x70] sm:$0xff]  ;;  %v167_v5 = vld [vmem:[%s297_s0 + $0x78] sm:$0xff] }
   0x3   :  { %v21_v6 = vld [vmem:[%s297_s0 + $0x40] sm:$0xf]  ;;  %v22_v7 = vld [vmem:[%s297_s0 + $0x48] sm:$0xf]  ;;  %v19_v8 = vld [vmem:[%s297_s0 + $0x30] sm:$0xff] }
   0x4   :  { %107 = vmatpush.msra.mxu2 %v168_v2  ;;  %127 = vmatpush.msra.mxu3 %v169_v3  ;;  %v20_v9 = vld [vmem:[%s297_s0 + $0x38] sm:$0xff]  ;;  %v164_v10 = vld [vmem:[%s297_s0 + $0x60] sm:$0xff]  ;;  %v165_v11 = vld [vmem:[%s297_s0 + $0x68] sm:$0xff] }
   0x5   :  { %158 = vmatpush.msk.msra.mxu0 %vm27_vm0, %v21_v6  ;;  %160 = vmatpush.msk.msra.mxu1 %vm27_vm0, %v22_v7  ;;  %v17_v12 = vld [vmem:[%s297_s0 + $0x20] sm:$0xff]  ;;  %v18_v13 = vld [vmem:[%s297_s0 + $0x28] sm:$0xff]  ;;  %v162_v14 = vld [vmem:[%s297_s0 + $0x50] sm:$0xff] }
   0x6   :  { %108 = vmatpush.msra.mxu2 %v166_v4  ;;  %128 = vmatpush.msra.mxu3 %v167_v5  ;;  %v163_v15 = vld [vmem:[%s297_s0 + $0x58] sm:$0xff]  ;;  %v12_v16 = vld [vmem:[%s298_s1] sm:$0xff] }
   0x7   :  { %46 = vmatpush.msra.mxu0 %v19_v8  ;;  %66 = vmatpush.msra.mxu1 %v20_v9 }
   0x8   :  { %109 = vmatpush.msra.mxu2 %v164_v10  ;;  %129 = vmatpush.msra.mxu3 %v165_v11 }
   0x9   :  { %7 = vsyncpa [#allocation3], 0  ;;  %47 = vmatpush.msra.mxu0 %v17_v12  ;;  %67 = vmatpush.msra.mxu1 %v18_v13  ;;  %v15_v17 = vld [vmem:[%s297_s0 + $0x10] sm:$0xff]  ;;  %v16_v18 = vld [vmem:[%s297_s0 + $0x18] sm:$0xff]  ;;  %s205_s22 = smov [#allocation2]   ;;  %s146_s26 = sshll.u32 %s299_s2, 4  ;;  %s147_s26 = int_to_ptr.hbm [resolvable:$true] %s146_s26 }
   0xa   :  { %110 = vmatpush.msra.mxu2 %v162_v14  ;;  %130 = vmatpush.msra.mxu3 %v163_v15  ;;  %v13_v19 = vld [vmem:[%s297_s0] sm:$0xff]  ;;  %v14_v20 = vld [vmem:[%s297_s0 + $0x8] sm:$0xff]  ;;  %s144_s23 = sshll.u32 %s205_s22, 4  ;;  %s206_s0 = smov 256   ;;  %s145_s23 = int_to_ptr.vmem [resolvable:$true] %s144_s23 }
   0xb   :  { %173 = vmatmul.msk.f32.vlgmr.msra.gmra.mxu2 %vm23_vm1, %v12_v16  ;;  %175 = vmatmul.msk.f32.vlgmr.msra.gmra.mxu3 %vm23_vm1, %v12_v16  ;;  %s207_s27 = smov 16  }
   0xc   :  { %48 = vmatpush.msra.mxu0 %v15_v17  ;;  %68 = vmatpush.msra.mxu1 %v16_v18 }
   0xe   :  { %49 = vmatpush.msra.mxu0 %v13_v19  ;;  %69 = vmatpush.msra.mxu1 %v14_v20 }
   0xf   :  { %159 = vmatmul.msk.f32.vlgmr.msra.gmra.mxu0 %vm23_vm1, %v12_v16  ;;  %161 = vmatmul.msk.f32.vlgmr.msra.gmra.mxu1 %vm23_vm1, %v12_v16 }
  0x8c   :  { %v51_v21 = vpop.f32.mrf.mxu0  ;;  %v71_v22 = vpop.f32.mrf.mxu1 }
  0x8d   :  { %v74_v23 = vmax.f32 %v51_v21, 0.0  ;;  %v75_v24 = vmax.f32 %v71_v22, 0.0 }
  0x8e   :  { %v112_v25 = vpop.f32.mrf.mxu2  ;;  %v132_v26 = vpop.f32.mrf.mxu3 }
  0x8f   :  { %76 = vst [vmem:[#allocation2] sm:$0xff] %v74_v23  ;;  %v135_v27 = vmax.f32 %v112_v25, 0.0  ;;  %v136_v28 = vmax.f32 %v132_v26, 0.0 }
  0x90   :  { %77 = vst [vmem:[#allocation2 + $0x8] sm:$0xff] %v75_v24 }
  0x91   :  { %138 = vst [vmem:[#allocation2 + $0x10] sm:$0xff] %v135_v27 }
  0x92   :  { %139 = vst [vmem:[#allocation2 + $0x18] sm:$0xff] %v136_v28 }
  0x93   :  { %152 = dma.vmem_to_hbm [thread:$0]  %s145_s23, 512, %s147_s26, [#allocation3], %s206_s0, %s206_s0, %s207_s27  }
  0x94   :  { %203 = dma.done.wait [#allocation3], 512  }
  0x95   :  { %204 = vsyncadd [#allocation3], 4294966784 }
  0x96   :  { %157 = vsyncpa [#allocation3], 1 }

</bundles_post_ra>
